<compile_context>
chip_gen: v5e
topology: v5e:2x2
jax: 0.10.0
libtpu: 0.0.40
codegen_flags: <defaults>
</compile_context>

<pallas_src>
import functools

import jax
import jax.numpy as jnp
from jax.experimental import pallas as pl
from jax.experimental.pallas import tpu as pltpu


# ----------------------------- Pallas kernels --------------------------------

def _batchnorm(x, gamma, beta, eps=1e-5):
    # torch.nn.BatchNorm1d in training mode: biased batch statistics.
    mu = jnp.mean(x, axis=0, keepdims=True)
    var = jnp.mean((x - mu) ** 2, axis=0, keepdims=True)
    return (x - mu) * jax.lax.rsqrt(var + eps) * gamma + beta


def tucker_stage1_kernel(e1_ref, r_ref, wlow_ref, whigh_ref, bn_ref, y_ref,
                         *, B, D1, D2):
    """Compute the stacked, bn1-normalized hidden activations y (2B, D1)."""
    e1 = e1_ref[...]                          # (B, D1) f32
    r = r_ref[...]                            # (B, D2) f32
    g0 = bn_ref[0:1, :]
    b0 = bn_ref[1:2, :]
    g1 = bn_ref[2:3, :]
    b1 = bn_ref[3:4, :]

    # bn0 once -- identical for both branches.
    x = _batchnorm(e1, g0, b0)                # (B, D1) f32

    # Row-wise Kronecker LHS: z[b, k*D1 + i] = r[b, k] * x[b, i].
    # With W reshaped (in the wrapper) to W2[(k, i), j] = W[k, i, j], one MXU
    # matmul z @ W2 equals torch's  bmm(x.view(B,1,D1), (r @ W.view(D2,-1)).view(B,D1,D1)).
    z = (r[:, :, None] * x[:, None, :]).reshape(B, D2 * D1).astype(jnp.bfloat16)

    y_low = jnp.dot(z, wlow_ref[...], preferred_element_type=jnp.float32)   # (B, D1)
    y_high = jnp.dot(z, whigh_ref[...], preferred_element_type=jnp.float32)  # (B, D1)

    # bn1 uses each branch's own batch statistics (as in the torch module),
    # then the two branches are stacked along the sublane axis for stage 2.
    y_ref[0:B, :] = _batchnorm(y_low, g1, b1).astype(y_ref.dtype)
    y_ref[B:2 * B, :] = _batchnorm(y_high, g1, b1).astype(y_ref.dtype)


def tucker_stage2_kernel(y_ref, et_ref, pre_ref, *, B):
    """Per entity tile: one stacked scoring matmul, sigmoid, branch average."""
    logits = jnp.dot(y_ref[...], et_ref[...],
                     preferred_element_type=jnp.float32)   # (2B, TILE_N)
    p = jax.nn.sigmoid(logits)
    pre_ref[...] = 0.5 * (p[0:B, :] + p[B:, :])


# ------------------------------ JAX wrapper ----------------------------------

def _renorm_rows(weight, idx, max_norm=2.0, p=3.0):
    # torch.nn.Embedding(max_norm=2, norm_type=3): renorm looked-up rows in place.
    rows = weight[idx]
    norms = jnp.sum(jnp.abs(rows) ** p, axis=-1) ** (1.0 / p)
    scale = jnp.where(norms > max_norm, max_norm / (norms + 1e-7), 1.0)
    return weight.at[idx].set(rows * scale[:, None])


def tucker_forward(e1_idx, r_idx, params, bias, *, tile_n=256):
    E = _renorm_rows(params["E"], e1_idx)          # in-place renorm as torch does
    R = params["R_low"]
    e1 = E[e1_idx].astype(jnp.float32)             # (B, D1)
    r = R[r_idx].astype(jnp.float32)               # (B, D2)
    B, D1 = e1.shape
    NE = E.shape[0]
    D2 = R.shape[1]

    # Core tensors pre-laid-out for the Kronecker contraction; bf16 MXU operands.
    # TODO(synk): at real TuckER sizes (d1=d2=200) stream W K-tiles from HBM
    # (memory_space=pl.ANY + pipelined accumulation) instead of whole-array VMEM.
    wlow2 = params["W_low"].reshape(D2 * D1, D1).astype(jnp.bfloat16)
    whigh2 = params["W_high"].reshape(D2 * D1, D1).astype(jnp.bfloat16)
    bn = jnp.stack([params["gamma0"], params["beta0"],
                    params["gamma1"], params["beta1"]]).astype(jnp.float32)

    # ---- stage 1: small fused kernel -> stacked hidden y (2B, D1) bf16 ------
    k1 = functools.partial(tucker_stage1_kernel, B=B, D1=D1, D2=D2)
    y_stacked = pl.pallas_call(
        k1,
        out_shape=jax.ShapeDtypeStruct((2 * B, D1), jnp.bfloat16),
        in_specs=[pl.BlockSpec(memory_space=pltpu.MemorySpace.VMEM)] * 5,
        out_specs=pl.BlockSpec(memory_space=pltpu.MemorySpace.VMEM),
    )(e1, r, wlow2, whigh2, bn)

    # ---- stage 2: scoring matmul gridded over lane-dense entity tiles -------
    tile_n = max(128, (tile_n // 128) * 128)
    ne_pad = pl.cdiv(NE, tile_n) * tile_n
    et = jnp.transpose(E).astype(jnp.bfloat16)     # (D1, NE), bf16 halves HBM bytes
    if ne_pad != NE:
        et = jnp.pad(et, ((0, 0), (0, ne_pad - NE)))
    num_tiles = ne_pad // tile_n

    # Explicit scoped-VMEM budget: double-buffered E^T tile + output tile + y.
    vmem_bytes = int(2 * D1 * tile_n * 2          # E^T tiles (bf16, 2 buffers)
                     + 2 * B * tile_n * 4         # output tiles (f32, 2 buffers)
                     + 2 * 2 * B * D1 * 2         # y_stacked (bf16)
                     + (8 << 20))                 # headroom

    k2 = functools.partial(tucker_stage2_kernel, B=B)
    pre = pl.pallas_call(
        k2,
        out_shape=jax.ShapeDtypeStruct((B, ne_pad), jnp.float32),
        grid=(num_tiles,),
        in_specs=[pl.BlockSpec((2 * B, D1), lambda n: (0, 0)),
                  pl.BlockSpec((D1, tile_n), lambda n: (0, n))],
        out_specs=pl.BlockSpec((B, tile_n), lambda n: (0, n)),
        compiler_params=pltpu.CompilerParams(
            dimension_semantics=("parallel",),      # shard entity tiles on v7x's 2 TCs
            vmem_limit_bytes=vmem_bytes),
    )(y_stacked, et)
    pre = pre[:, :NE]

    # W_temp: scalar clamp-mean, computed by XLA so the kernels never re-read W.
    w_temp = jnp.mean(jnp.maximum(
        params["W_low"] - params["W_high"] + bias, -0.0)).astype(jnp.float32)
    return pre, w_temp


# --------------------------- pure-JAX reference ------------------------------

def tucker_reference(e1_idx, r_idx, params, bias):
    E = _renorm_rows(params["E"], e1_idx)
    e1 = E[e1_idx]
    r = params["R_low"][r_idx]
    B, D1 = e1.shape
    D2 = r.shape[1]
    g0, b0, g1, b1 = (params["gamma0"], params["beta0"],
                      params["gamma1"], params["beta1"])

    def branch(W):
        x = _batchnorm(e1, g0[None, :], b0[None, :])
        w_mat = (r @ W.reshape(D2, D1 * D1)).reshape(B, D1, D1)
        y = jnp.einsum("bi,bij->bj", x, w_mat)
        y = _batchnorm(y, g1[None, :], b1[None, :])
        return jax.nn.sigmoid(y @ E.T)

    pred1 = branch(params["W_low"])
    pred2 = branch(params["W_high"])
    pre = (pred1 + pred2) / 2.0
    w_temp = jnp.mean(jnp.maximum(params["W_low"] - params["W_high"] + bias, -0.0))
    return pre, w_temp


# --------------------------------- main ---------------------------------------

if __name__ == "__main__":
    # Small synthetic "dataset": 640 entities, 8 relations, d1=32, d2=16, batch=8.
    # NE=640 with tile_n=256 exercises the entity grid (3 tiles) + tail padding.
    NE, NR, D1, D2, B = 640, 8, 32, 16, 8
    BIAS = 0.1

    key = jax.random.PRNGKey(0)
    k_e, k_r, k_wl, k_wh, k_i1, k_i2 = jax.random.split(key, 6)

    params = {
        # xavier_normal_: std = sqrt(2 / (fan_in + fan_out))
        "E": jax.random.normal(k_e, (NE, D1), jnp.float32) * jnp.sqrt(2.0 / (NE + D1)),
        "R_low": jax.random.normal(k_r, (NR, D2), jnp.float32) * jnp.sqrt(2.0 / (NR + D2)),
        # np.random.uniform(0, 0.5) / (0.5, 1)
        "W_low": jax.random.uniform(k_wl, (D2, D1, D1), jnp.float32, 0.0, 0.5),
        "W_high": jax.random.uniform(k_wh, (D2, D1, D1), jnp.float32, 0.5, 1.0),
        # BatchNorm1d default affine init
        "gamma0": jnp.ones((D1,), jnp.float32),
        "beta0": jnp.zeros((D1,), jnp.float32),
        "gamma1": jnp.ones((D1,), jnp.float32),
        "beta1": jnp.zeros((D1,), jnp.float32),
    }

    e1_idx = jax.random.randint(k_i1, (B,), 0, NE, dtype=jnp.int32)
    r_idx = jax.random.randint(k_i2, (B,), 0, NR, dtype=jnp.int32)

    fwd = jax.jit(lambda a, b: tucker_forward(a, b, params, BIAS))
    pre, w_temp = fwd(e1_idx, r_idx)
    jax.block_until_ready((pre, w_temp))

    pre_ref, w_temp_ref = tucker_reference(e1_idx, r_idx, params, BIAS)
    assert pre.shape == (B, NE) and w_temp.shape == ()
    # bf16 MXU inputs (f32 accumulate) vs. an all-f32 reference -> relaxed tol.
    assert jnp.allclose(pre, pre_ref, atol=1e-2, rtol=1e-2), "pred mismatch"
    assert jnp.allclose(w_temp, w_temp_ref, atol=1e-5, rtol=1e-5), "W_temp mismatch"

    print("KERNEL_OK")
</pallas_src>

<mosaic_0001>
module attributes {stable_mosaic.version = 11 : i64} {
  func.func @tucker_stage1_kernel(%arg0: memref<8x32xf32, #tpu.memory_space<vmem>>, %arg1: memref<8x16xf32, #tpu.memory_space<vmem>>, %arg2: memref<512x32xbf16, #tpu.memory_space<vmem>>, %arg3: memref<512x32xbf16, #tpu.memory_space<vmem>>, %arg4: memref<4x32xf32, #tpu.memory_space<vmem>>, %arg5: memref<16x32xbf16, #tpu.memory_space<vmem>>) attributes {dimension_semantics = [], scalar_prefetch = 0 : i64, scratch_operands = 0 : i64, tpu.core_type = #tpu.core_type<tc>} {
    %c0 = arith.constant 0 : index
    %c0_0 = arith.constant 0 : index
    %0 = vector.load %arg0[%c0, %c0_0] : memref<8x32xf32, #tpu.memory_space<vmem>>, vector<8x32xf32>
    %c0_1 = arith.constant 0 : index
    %c0_2 = arith.constant 0 : index
    %1 = vector.load %arg1[%c0_1, %c0_2] : memref<8x16xf32, #tpu.memory_space<vmem>>, vector<8x16xf32>
    %c0_3 = arith.constant 0 : index
    %c0_4 = arith.constant 0 : index
    %2 = vector.load %arg4[%c0_3, %c0_4] : memref<4x32xf32, #tpu.memory_space<vmem>>, vector<1x32xf32>
    %c1 = arith.constant 1 : index
    %c0_5 = arith.constant 0 : index
    %3 = vector.load %arg4[%c1, %c0_5] : memref<4x32xf32, #tpu.memory_space<vmem>>, vector<1x32xf32>
    %c2 = arith.constant 2 : index
    %c0_6 = arith.constant 0 : index
    %4 = vector.load %arg4[%c2, %c0_6] : memref<4x32xf32, #tpu.memory_space<vmem>>, vector<1x32xf32>
    %c3 = arith.constant 3 : index
    %c0_7 = arith.constant 0 : index
    %5 = vector.load %arg4[%c3, %c0_7] : memref<4x32xf32, #tpu.memory_space<vmem>>, vector<1x32xf32>
    %cst = arith.constant dense<0.000000e+00> : vector<32xf32>
    %6 = vector.multi_reduction <add>, %0, %cst [0] : vector<8x32xf32> to vector<32xf32>
    %7 = vector.shape_cast %6 : vector<32xf32> to vector<1x32xf32>
    %cst_8 = arith.constant 8.000000e+00 : f32
    %8 = vector.broadcast %cst_8 : f32 to vector<1x32xf32>
    %9 = arith.divf %7, %8 : vector<1x32xf32>
    %10 = vector.broadcast %9 : vector<1x32xf32> to vector<8x32xf32>
    %11 = arith.subf %0, %10 : vector<8x32xf32>
    %12 = arith.mulf %11, %11 : vector<8x32xf32>
    %cst_9 = arith.constant dense<0.000000e+00> : vector<32xf32>
    %13 = vector.multi_reduction <add>, %12, %cst_9 [0] : vector<8x32xf32> to vector<32xf32>
    %14 = vector.shape_cast %13 : vector<32xf32> to vector<1x32xf32>
    %cst_10 = arith.constant 8.000000e+00 : f32
    %15 = vector.broadcast %cst_10 : f32 to vector<1x32xf32>
    %16 = arith.divf %14, %15 : vector<1x32xf32>
    %17 = vector.broadcast %9 : vector<1x32xf32> to vector<8x32xf32>
    %18 = arith.subf %0, %17 : vector<8x32xf32>
    %cst_11 = arith.constant 9.99999974E-6 : f32
    %19 = vector.broadcast %cst_11 : f32 to vector<1x32xf32>
    %20 = arith.addf %16, %19 : vector<1x32xf32>
    %21 = math.rsqrt %20 : vector<1x32xf32>
    %22 = vector.broadcast %21 : vector<1x32xf32> to vector<8x32xf32>
    %23 = arith.mulf %18, %22 : vector<8x32xf32>
    %24 = vector.broadcast %2 : vector<1x32xf32> to vector<8x32xf32>
    %25 = arith.mulf %23, %24 : vector<8x32xf32>
    %26 = vector.broadcast %3 : vector<1x32xf32> to vector<8x32xf32>
    %27 = arith.addf %25, %26 : vector<8x32xf32>
    %28 = vector.shape_cast %1 : vector<8x16xf32> to vector<8x16x1xf32>
    %29 = vector.shape_cast %27 : vector<8x32xf32> to vector<8x1x32xf32>
    %30 = vector.broadcast %28 : vector<8x16x1xf32> to vector<8x16x32xf32>
    %31 = vector.broadcast %29 : vector<8x1x32xf32> to vector<8x16x32xf32>
    %32 = arith.mulf %30, %31 : vector<8x16x32xf32>
    %33 = vector.shape_cast %32 : vector<8x16x32xf32> to vector<8x512xf32>
    %34 = arith.truncf %33 : vector<8x512xf32> to vector<8x512xbf16>
    %c0_12 = arith.constant 0 : index
    %c0_13 = arith.constant 0 : index
    %35 = vector.load %arg2[%c0_12, %c0_13] : memref<512x32xbf16, #tpu.memory_space<vmem>>, vector<512x32xbf16>
    %cst_14 = arith.constant dense<0.000000e+00> : vector<8x32xf32>
    %36 = tpu.matmul %34, %35, %cst_14 {dimension_numbers = #tpu.dot_dimension_numbers<[1], [0], [0], [1], [0, 0, 1, 1], [], []>} : vector<8x512xbf16>, vector<512x32xbf16>, vector<8x32xf32> -> vector<8x32xf32>
    %c0_15 = arith.constant 0 : index
    %c0_16 = arith.constant 0 : index
    %37 = vector.load %arg3[%c0_15, %c0_16] : memref<512x32xbf16, #tpu.memory_space<vmem>>, vector<512x32xbf16>
    %cst_17 = arith.constant dense<0.000000e+00> : vector<8x32xf32>
    %38 = tpu.matmul %34, %37, %cst_17 {dimension_numbers = #tpu.dot_dimension_numbers<[1], [0], [0], [1], [0, 0, 1, 1], [], []>} : vector<8x512xbf16>, vector<512x32xbf16>, vector<8x32xf32> -> vector<8x32xf32>
    %cst_18 = arith.constant dense<0.000000e+00> : vector<32xf32>
    %39 = vector.multi_reduction <add>, %36, %cst_18 [0] : vector<8x32xf32> to vector<32xf32>
    %40 = vector.shape_cast %39 : vector<32xf32> to vector<1x32xf32>
    %cst_19 = arith.constant 8.000000e+00 : f32
    %41 = vector.broadcast %cst_19 : f32 to vector<1x32xf32>
    %42 = arith.divf %40, %41 : vector<1x32xf32>
    %43 = vector.broadcast %42 : vector<1x32xf32> to vector<8x32xf32>
    %44 = arith.subf %36, %43 : vector<8x32xf32>
    %45 = arith.mulf %44, %44 : vector<8x32xf32>
    %cst_20 = arith.constant dense<0.000000e+00> : vector<32xf32>
    %46 = vector.multi_reduction <add>, %45, %cst_20 [0] : vector<8x32xf32> to vector<32xf32>
    %47 = vector.shape_cast %46 : vector<32xf32> to vector<1x32xf32>
    %cst_21 = arith.constant 8.000000e+00 : f32
    %48 = vector.broadcast %cst_21 : f32 to vector<1x32xf32>
    %49 = arith.divf %47, %48 : vector<1x32xf32>
    %50 = vector.broadcast %42 : vector<1x32xf32> to vector<8x32xf32>
    %51 = arith.subf %36, %50 : vector<8x32xf32>
    %cst_22 = arith.constant 9.99999974E-6 : f32
    %52 = vector.broadcast %cst_22 : f32 to vector<1x32xf32>
    %53 = arith.addf %49, %52 : vector<1x32xf32>
    %54 = math.rsqrt %53 : vector<1x32xf32>
    %55 = vector.broadcast %54 : vector<1x32xf32> to vector<8x32xf32>
    %56 = arith.mulf %51, %55 : vector<8x32xf32>
    %57 = vector.broadcast %4 : vector<1x32xf32> to vector<8x32xf32>
    %58 = arith.mulf %56, %57 : vector<8x32xf32>
    %59 = vector.broadcast %5 : vector<1x32xf32> to vector<8x32xf32>
    %60 = arith.addf %58, %59 : vector<8x32xf32>
    %61 = arith.truncf %60 : vector<8x32xf32> to vector<8x32xbf16>
    %c0_23 = arith.constant 0 : index
    %c0_24 = arith.constant 0 : index
    %62 = vector.load %arg5[%c0_23, %c0_24] : memref<16x32xbf16, #tpu.memory_space<vmem>>, vector<8x32xbf16>
    tpu.vector_store %arg5[%c0_23, %c0_24], %61 {strides = array<i32>} : memref<16x32xbf16, #tpu.memory_space<vmem>>, vector<8x32xbf16>,
    %cst_25 = arith.constant dense<0.000000e+00> : vector<32xf32>
    %63 = vector.multi_reduction <add>, %38, %cst_25 [0] : vector<8x32xf32> to vector<32xf32>
    %64 = vector.shape_cast %63 : vector<32xf32> to vector<1x32xf32>
    %cst_26 = arith.constant 8.000000e+00 : f32
    %65 = vector.broadcast %cst_26 : f32 to vector<1x32xf32>
    %66 = arith.divf %64, %65 : vector<1x32xf32>
    %67 = vector.broadcast %66 : vector<1x32xf32> to vector<8x32xf32>
    %68 = arith.subf %38, %67 : vector<8x32xf32>
    %69 = arith.mulf %68, %68 : vector<8x32xf32>
    %cst_27 = arith.constant dense<0.000000e+00> : vector<32xf32>
    %70 = vector.multi_reduction <add>, %69, %cst_27 [0] : vector<8x32xf32> to vector<32xf32>
    %71 = vector.shape_cast %70 : vector<32xf32> to vector<1x32xf32>
    %cst_28 = arith.constant 8.000000e+00 : f32
    %72 = vector.broadcast %cst_28 : f32 to vector<1x32xf32>
    %73 = arith.divf %71, %72 : vector<1x32xf32>
    %74 = vector.broadcast %66 : vector<1x32xf32> to vector<8x32xf32>
    %75 = arith.subf %38, %74 : vector<8x32xf32>
    %cst_29 = arith.constant 9.99999974E-6 : f32
    %76 = vector.broadcast %cst_29 : f32 to vector<1x32xf32>
    %77 = arith.addf %73, %76 : vector<1x32xf32>
    %78 = math.rsqrt %77 : vector<1x32xf32>
    %79 = vector.broadcast %78 : vector<1x32xf32> to vector<8x32xf32>
    %80 = arith.mulf %75, %79 : vector<8x32xf32>
    %81 = vector.broadcast %4 : vector<1x32xf32> to vector<8x32xf32>
    %82 = arith.mulf %80, %81 : vector<8x32xf32>
    %83 = vector.broadcast %5 : vector<1x32xf32> to vector<8x32xf32>
    %84 = arith.addf %82, %83 : vector<8x32xf32>
    %85 = arith.truncf %84 : vector<8x32xf32> to vector<8x32xbf16>
    %c8 = arith.constant 8 : index
    %c0_30 = arith.constant 0 : index
    %86 = vector.load %arg5[%c8, %c0_30] : memref<16x32xbf16, #tpu.memory_space<vmem>>, vector<8x32xbf16>
    tpu.vector_store %arg5[%c8, %c0_30], %85 {strides = array<i32>} : memref<16x32xbf16, #tpu.memory_space<vmem>>, vector<8x32xbf16>,
    return
  }
}

module attributes {stable_mosaic.version = 11 : i64} {
  func.func @tucker_stage2_kernel(%arg0: i32, %arg1: memref<16x32xbf16, #tpu.memory_space<vmem>>, %arg2: memref<32x256xbf16, #tpu.memory_space<vmem>>, %arg3: memref<8x256xf32, #tpu.memory_space<vmem>>) attributes {dimension_semantics = [#tpu.dimension_semantics<parallel>], iteration_bounds = array<i64: 3>, scalar_prefetch = 0 : i64, scratch_operands = 0 : i64, tpu.core_type = #tpu.core_type<tc>, window_params = [{pipeline_mode = #tpu.pipeline_mode<synchronous>, transform_indices = @transform_0, window_bounds = array<i64: 16, 32>}, {transform_indices = @transform_1, window_bounds = array<i64: 32, 256>}, {transform_indices = @transform_2, window_bounds = array<i64: 8, 256>}]} {
    %c0 = arith.constant 0 : index
    %c0_0 = arith.constant 0 : index
    %0 = vector.load %arg1[%c0, %c0_0] : memref<16x32xbf16, #tpu.memory_space<vmem>>, vector<16x32xbf16>
    %c0_1 = arith.constant 0 : index
    %c0_2 = arith.constant 0 : index
    %1 = vector.load %arg2[%c0_1, %c0_2] : memref<32x256xbf16, #tpu.memory_space<vmem>>, vector<32x256xbf16>
    %cst = arith.constant dense<0.000000e+00> : vector<16x256xf32>
    %2 = tpu.matmul %0, %1, %cst {dimension_numbers = #tpu.dot_dimension_numbers<[1], [0], [0], [1], [0, 0, 1, 1], [], []>} : vector<16x32xbf16>, vector<32x256xbf16>, vector<16x256xf32> -> vector<16x256xf32>
    %3 = arith.negf %2 : vector<16x256xf32>
    %4 = math.exp %3 : vector<16x256xf32>
    %cst_3 = arith.constant 1.000000e+00 : f32
    %5 = vector.broadcast %cst_3 : f32 to vector<16x256xf32>
    %6 = arith.addf %5, %4 : vector<16x256xf32>
    %7 = arith.divf %5, %6 : vector<16x256xf32>
    %8 = vector.extract_strided_slice %7 {offsets = [0, 0], sizes = [8, 256], strides = [1, 1]} : vector<16x256xf32> to vector<8x256xf32>
    %9 = vector.extract_strided_slice %7 {offsets = [8, 0], sizes = [8, 256], strides = [1, 1]} : vector<16x256xf32> to vector<8x256xf32>
    %10 = arith.addf %8, %9 : vector<8x256xf32>
    %cst_4 = arith.constant 5.000000e-01 : f32
    %11 = vector.broadcast %cst_4 : f32 to vector<8x256xf32>
    %12 = arith.mulf %11, %10 : vector<8x256xf32>
    %c0_5 = arith.constant 0 : index
    %c0_6 = arith.constant 0 : index
    %13 = vector.load %arg3[%c0_5, %c0_6] : memref<8x256xf32, #tpu.memory_space<vmem>>, vector<8x256xf32>
    tpu.vector_store %arg3[%c0_5, %c0_6], %12 {strides = array<i32>} : memref<8x256xf32, #tpu.memory_space<vmem>>, vector<8x256xf32>,
    return
  }
  func.func @transform_0(%arg0: i32) -> (i32, i32) {
    %c0_i32 = arith.constant 0 : i32
    %c0_i32_0 = arith.constant 0 : i32
    %c0_i32_1 = arith.constant 0 : i32
    return %c0_i32, %c0_i32_0 : i32, i32
  }
  func.func @transform_1(%arg0: i32) -> (i32, i32) {
    %c0_i32 = arith.constant 0 : i32
    %c0_i32_0 = arith.constant 0 : i32
    return %c0_i32, %arg0 : i32, i32
  }
  func.func @transform_2(%arg0: i32) -> (i32, i32) {
    %c0_i32 = arith.constant 0 : i32
    %c0_i32_0 = arith.constant 0 : i32
    return %c0_i32, %arg0 : i32, i32
  }
}

</mosaic_0001>

<bundles_post_ra>
// kernel: _lambda_.3
= control target key start
LH: loop header
LB: loop body
LE: loop exit
PB: predicated region body
PF: predicated region fallthrough
CT: control target
= control target key end

     0   :  { %s526_s9 = smov 0   ;;  %s528_s10 = smov 0   ;;  %s614_s0 = inlined_call_operand.vmem [shape: bf16[16,32], index: 0, kind: input, shape index: {}]   ;;  %s615_s1 = inlined_call_operand.vmem [shape: bf16[32,768], index: 1, kind: input, shape index: {}]   ;;  %s616_s2 = inlined_call_operand.vmem [shape: f32[8,768], index: 2, kind: output, shape index: {}]  }
   0x1   :  { %s530_s11 = smov 0  }
   0x2 LB: > { %s402_s12 = sadd.s32 4294967295, %s509_s11   ;;  %s543_s13 = sadd.s32 1, %s509_s11   ;;  %s509_s11 = sphi %s530_s11, %s623_s11   ;;  %s505_s10 = sphi %s528_s10, %s622_s10   ;;  %s501_s9 = sphi %s526_s9, %s621_s9  }
   0x3   : > { %s37_s14 = ssub.s32 %s509_s11, %s543_s13  ;;  %s40_s15 = sadd.s32 1, %s505_s10 }
   0x4   : > { %p38_p0 = scmp.eq.s32.totalorder %s37_s14, 0  ;;  %p47_p1 = scmp.ne.s32.totalorder %s505_s10, %s501_s9 }
   0x5   : > { %p48_p2 = scmp.eq.s32.totalorder %s509_s11, 0  ;;  %p405_p4 = scmp.ge.s32.totalorder %s509_s11, 3 }
   0x6   : > { %s552_s16 = scalar_select %p38_p0, %s505_s10, %s40_s15  }
   0x7   : > { %p49_p3 = por %p48_p2, %p47_p1  ;;  %102 = sbr.rel (%p405_p4) target bundleno = 20 (0x14), region = 20 }
   0xc   : > { %105 = sbr.rel (!%p49_p3) target bundleno = 20 (0x14), region = 24  ;;  %s107_s17 = sand.u32 (%p49_p3), 1, %s505_s10  }
   0xd   : > { %s441_s18 = sshll.u32 (%p49_p3), %s509_s11, 3  ;;  %s406_s19 = sshll.u32 (%p49_p3), %s107_s17, 5 }
   0xe   : > { %s112_s22 = scalar_lea.vmem (%p49_p3), %s615_s1, %s441_s18  ;;  %s109_s23 = scalar_lea.vmem (%p49_p3), [#allocation2], %s406_s19 }
   0xf   : > { %v147_v0 = vld [vmem:[%s112_s22] sm:$0xff] (%p49_p3)  ;;  %v149_v1 = vld [vmem:[%s112_s22 + $0x18] sm:$0xff] (%p49_p3)  ;;  %v151_v2 = vld [vmem:[%s112_s22 + $0x30] sm:$0xff] (%p49_p3) }
  0x10   : > { %148 = vst [vmem:[%s109_s23] sm:$0xff] (%p49_p3), %v147_v0  ;;  %v153_v3 = vld [vmem:[%s112_s22 + $0x48] sm:$0xff] (%p49_p3) }
  0x11   : > { %150 = vst [vmem:[%s109_s23 + $0x8] sm:$0xff] %v149_v1 }
  0x12   : > { %152 = vst [vmem:[%s109_s23 + $0x10] sm:$0xff] %v151_v2 }
  0x13   : > { %154 = vst [vmem:[%s109_s23 + $0x18] sm:$0xff] %v153_v3 }
  0x14 PF: > { %p409_p5 = scmp.ge.s32.totalorder %s509_s11, 1  ;;  %p159_p6 = scmp.lt.s32.totalorder %s509_s11, 4 }
  0x16   : > { %p160_p7 = pnand %p409_p5, %p159_p6 }
  0x17   : > { %s166_s24 = sand.u32 (!%p160_p7), 1, %s501_s9   ;;  %s411_s29 = sshll.u32 (!%p160_p7), %s402_s12, 1 }
  0x18   : > { %163 = sbr.rel (%p160_p7) target bundleno = 209 (0xd1), region = 62  ;;  %s410_s25 = sshll.u32 (!%p160_p7), %s166_s24, 5 }
  0x19   : > { %s168_s26 = scalar_lea.vmem (!%p160_p7), [#allocation2], %s410_s25  ;;  %p189_p8 = scmp.lt.s32.totalorder (!%p160_p7), %s411_s29, 5 }
  0x1d   : > { %v427_v4 = vld [vmem:[%s168_s26 + $0x10] sm:$0xf]  ;;  %v446_v5 = vld [vmem:[%s168_s26 + $0x14] sm:$0xf0]  ;;  %v445_v6 = vld [vmem:[%s168_s26 + $0x14] sm:$0xf] }
  0x1e   : > { %v428_v7 = vor.u32 %v446_v5, %v427_v4  ;;  %v429_v8 = vld [vmem:[%s168_s26 + $0x18] sm:$0xf0]  ;;  %v419_v9 = vld [vmem:[%s168_s26] sm:$0xf]  ;;  %v444_v10 = vld [vmem:[%s168_s26 + $0x4] sm:$0xf0] }
  0x1f   : > { %v432_v11 = vor.u32 %v445_v6, %v429_v8  ;;  %v443_v12 = vld [vmem:[%s168_s26 + $0x4] sm:$0xf]  ;;  %v421_v13 = vld [vmem:[%s168_s26 + $0x8] sm:$0xf0]  ;;  %v420_v14 = vor.u32 %v444_v10, %v419_v9  ;;  %vm226_vm0 = vcmask 261120   ;;  %s625_s29 = smov (!%p189_p8, %s411_s29), 5 }
  0x20   : > { %236 = vmatpush.bf16.msra.mxu0 %v428_v7  ;;  %v424_v15 = vor.u32 %v443_v12, %v421_v13  ;;  %v442_v16 = vld [vmem:[%s614_s0] sm:$0xff]  ;;  %s412_s30 = sshll.u32 %s625_s29, 3 }
  0x21   : > { %250 = vmatpush.bf16.msra.mxu1 %v432_v11  ;;  %s192_s5 = scalar_lea.vmem %s616_s2, %s412_s30 }
  0x24   : > { %237 = vmatpush.bf16.msra.mxu0 %v420_v14 }
  0x25   : > { %251 = vmatpush.bf16.msra.mxu1 %v424_v15 }
  0x27   : > { %433 = vmatmul.msk.bf16.vlgmr.msra.gmra.mxu0 %vm226_vm0, %v442_v16 }
  0x28   : > { %434 = vmatmul.msk.bf16.vlgmr.msra.gmra.mxu1 %vm226_vm0, %v442_v16 }
  0xa4   : > { %v239_v17 = vpop.f32.mrf.mxu0 }
  0xa5   : > { %v435_v18 = vmul.f32 -1.442695, %v239_v17  ;;  %v253_v19 = vpop.f32.mrf.mxu1 }
  0xa6   : > { %v436_v20 = vmul.f32 -1.442695, %v253_v19 }
  0xa7   : > { %471 = vpow2.f32 %v435_v18 }
  0xa8   : > { %473 = vpow2.f32 %v436_v20 }
  0xac   : > { %v241_v21 = vpop.f32.mrf.mxu0 }
  0xad   : > { %v472_v22 = vpop.eup %471  ;;  %v437_v23 = vmul.f32 -1.442695, %v241_v21  ;;  %v255_v24 = vpop.f32.mrf.mxu1 }
  0xae   : > { %v474_v25 = vpop.eup %473  ;;  %v270_v26 = vadd.f32 1.0, %v472_v22  ;;  %v438_v27 = vmul.f32 -1.442695, %v255_v24 }
  0xaf   : > { %v566_v28 = vadd.f32 1.0, %v474_v25  ;;  %475 = vpow2.f32 %v437_v23 }
  0xb0   : > { %477 = vrcp.f32 %v270_v26  ;;  %vm279_vm1 = vweird.f32 %v270_v26  ;;  %v285_v42 = vand.u32 2147483648, %v270_v26  ;;  %v283_v46 = vand.u32 2147483647, %v270_v26 }
  0xb1   : > { %479 = vrcp.f32 %v566_v28  ;;  %vm294_vm3 = vweird.f32 %v566_v28  ;;  %v298_v48 = vand.u32 2147483647, %v566_v28  ;;  %v300_v51 = vand.u32 2147483648, %v566_v28 }
  0xb2   : > { %481 = vpow2.f32 %v438_v27  ;;  %v286_v55 = vor.u32 1.1754944e-38, %v285_v42  ;;  %vm284_vm10 = vcmp.eq.f32.partialorder %v283_v46, 8.507059e+37 }
  0xb3   : > { %v301_v6 = vor.u32 1.1754944e-38, %v300_v51  ;;  %vm299_vm15 = vcmp.eq.f32.partialorder %v298_v48, 8.507059e+37 }
  0xb5   : > { %v476_v29 = vpop.eup %475 }
  0xb6   : > { %v478_v30 = vpop.eup %477  ;;  %v272_v31 = vadd.f32 1.0, %v476_v29 }
  0xb7   : > { %v569_v32 = vpop.eup %479  ;;  %v275_v33 = vmul.f32 %v478_v30, %v270_v26  ;;  %vm280_vm2 = vweird.f32 %v478_v30 }
  0xb8   : > { %v482_v34 = vpop.eup %481  ;;  %v290_v35 = vmul.f32 %v569_v32, %v566_v28  ;;  %483 = vrcp.f32 %v272_v31  ;;  %v315_v49 = vand.u32 2147483648, %v272_v31  ;;  %v313_v53 = vand.u32 2147483647, %v272_v31  ;;  %vm583_vm5 = vmor %vm279_vm1, %vm280_vm2 }
  0xb9   : > { %v276_v36 = vsub.f32 1.0, %v275_v33  ;;  %v273_v37 = vadd.f32 1.0, %v482_v34  ;;  %vm295_vm6 = vweird.f32 %v569_v32  ;;  %vm309_vm7 = vweird.f32 %v272_v31 }
  0xba   : > { %v291_v38 = vsub.f32 1.0, %v290_v35  ;;  %v316_v61 = vor.u32 1.1754944e-38, %v315_v49  ;;  %vm593_vm11 = vmor %vm294_vm3, %vm295_vm6  ;;  %vm314_vm12 = vcmp.eq.f32.partialorder %v313_v53, 8.507059e+37 }
  0xbb   : > { %485 = vrcp.f32 %v273_v37  ;;  %v277_v39 = vmul.f32 %v478_v30, %v276_v36  ;;  %v330_v60 = vand.u32 2147483648, %v273_v37  ;;  %v328_v63 = vand.u32 2147483647, %v273_v37 }
  0xbc   : > { %v292_v43 = vmul.f32 %v569_v32, %v291_v38  ;;  %vm324_vm13 = vweird.f32 %v273_v37 }
  0xbd   : > { %v278_v45 = vadd.f32 %v478_v30, %v277_v39  ;;  %v331_v8 = vor.u32 1.1754944e-38, %v330_v60  ;;  %vm329_vm0 = vcmp.eq.f32.partialorder %v328_v63, 8.507059e+37 }
  0xbe   : > { %v484_v40 = vpop.eup %483  ;;  %v293_v56 = vadd.f32 %v569_v32, %v292_v43 }
  0xbf   : > { %v305_v41 = vmul.f32 %v484_v40, %v272_v31  ;;  %vm310_vm4 = vweird.f32 %v484_v40  ;;  %v282_v58 = vsel %vm583_vm5, %v478_v30, %v278_v45 }
  0xc0   : > { %vm311_vm8 = vmor %vm309_vm7, %vm310_vm4  ;;  %v287_v2 = vsel %vm284_vm10, %v286_v55, %v282_v58  ;;  %v297_v3 = vsel %vm593_vm11, %v569_v32, %v293_v56 }
  0xc1   : > { %v486_v44 = vpop.eup %485  ;;  %v306_v47 = vsub.f32 1.0, %v305_v41  ;;  %v302_v10 = vsel %vm299_vm15, %v301_v6, %v297_v3 }
  0xc2   : > { %v320_v50 = vmul.f32 %v486_v44, %v273_v37  ;;  %vm325_vm9 = vweird.f32 %v486_v44 }
  0xc3   : > { %v307_v52 = vmul.f32 %v484_v40, %v306_v47  ;;  %vm326_vm14 = vmor %vm324_vm13, %vm325_vm9 }
  0xc4   : > { %v321_v57 = vsub.f32 1.0, %v320_v50 }
  0xc5   : > { %v308_v59 = vadd.f32 %v484_v40, %v307_v52 }
  0xc6   : > { %v322_v62 = vmul.f32 %v486_v44, %v321_v57 }
  0xc7   : > { %v312_v1 = vsel %vm311_vm8, %v484_v40, %v308_v59 }
  0xc8   : > { %v317_v4 = vsel %vm314_vm12, %v316_v61, %v312_v1  ;;  %v323_v5 = vadd.f32 %v486_v44, %v322_v62 }
  0xc9   : > { %v334_v7 = vadd.f32 %v317_v4, %v287_v2 }
  0xca   : > { %v327_v9 = vsel %vm326_vm14, %v486_v44, %v323_v5 }
  0xcb   : > { %v336_v11 = vmul.f32 0.5, %v334_v7  ;;  %v332_v12 = vsel %vm329_vm0, %v331_v8, %v327_v9 }
  0xcc   : > { %v335_v13 = vadd.f32 %v332_v12, %v302_v10 }
  0xcd   : > { %338 = vst [vmem:[%s192_s5] sm:$0xff] %v336_v11 }
  0xce   : > { %v337_v14 = vmul.f32 0.5, %v335_v13 }
  0xd0   : > { %339 = vst [vmem:[%s192_s5 + $0x8] sm:$0xff] %v337_v14 }
  0xd1 PF: > { %p9_p9 = scmp.ge.s32.totalorder %s543_s13, 5   ;;  %s621_s9 = smov %s505_s10 }
  0xd2   : > { %s622_s10 = smov %s552_s16  ;;  %s623_s11 = smov %s543_s13 }
  0xd3   :  { %11 = sbr.rel (!%p9_p9) target bundleno = 2 (0x2), region = 101 }

// kernel: _lambda_.2
= control target key start
LH: loop header
LB: loop body
LE: loop exit
PB: predicated region body
PF: predicated region fallthrough
CT: control target
= control target key end

     0   :  { %v69_v0 = vlaneseq  ;;  %vm26_vm0 = vcmask 261120   ;;  %v1569_v11 = vmov 8.0   ;;  %vm213_vm5 = vcmask 1047556   ;;  %s1572_s7 = smov 96   ;;  %s1573_s12 = smov 64   ;;  %s1993_s4 = inlined_call_operand.vmem [shape: f32[4,32], index: 4, kind: input, shape index: {}]   ;;  %s1994_s1 = inlined_call_operand.vmem [shape: f32[8,16], index: 1, kind: input, shape index: {}]   ;;  %s1995_s0 = inlined_call_operand.vmem [shape: f32[8,32], index: 0, kind: input, shape index: {}]   ;;  %s1996_s2 = inlined_call_operand.vmem [shape: bf16[512,32], index: 2, kind: input, shape index: {}]   ;;  %s1997_s3 = inlined_call_operand.vmem [shape: bf16[512,32], index: 3, kind: input, shape index: {}]   ;;  %s1998_s5 = inlined_call_operand.vmem [shape: bf16[16,32], index: 5, kind: output, shape index: {}]  }
   0x1   :  { %v21_v3 = vld [vmem:[%s1994_s1] sm:$0xff]  ;;  %1561 = vrcp.f32 %v1569_v11  ;;  %s1574_s13 = smov 32   ;;  %vm486_vm6 = vcmask 523264   ;;  %vm488_vm7 = vcmask 785408   ;;  %vm1154_vm11 = vcmask 257024  }
   0x2   :  { %v70_v1 = vshrl.u32 %v69_v0, 7  ;;  %v107_v4 = vperm.slane %v21_v3, 3  ;;  %v81_v5 = vperm.slane %v21_v3, 1  ;;  %v159_v6 = vperm.slane %v21_v3, 7  ;;  %v20_v12 = vld [vmem:[%s1995_s0] sm:$0xff] }
   0x3   :  { %v146_v7 = vperm.slane %v21_v3, 6  ;;  %v94_v8 = vperm.slane %v21_v3, 2  ;;  %v120_v9 = vperm.slane %v21_v3, 4  ;;  %v68_v10 = vperm.slane %v21_v3, 0  ;;  %v1557_v46 = vld [vmem:[%s1993_s4] ss:$0 sm:$0xff] }
   0x4   :  { %v77_v2 = vadd.s32 8, %v70_v1  ;;  %v27_v13 = vsel %vm26_vm0, %v20_v12, 0.0  ;;  %v133_v14 = vperm.slane %v21_v3, 5  ;;  %v1558_v48 = vld [vmem:[%s1993_s4 + $0x1] ss:$0 sm:$0xff] }
   0x5   :  { %v28_v15 = vrot.slane %v27_v13, 4 }
   0x6   :  { %1521 = vset.pattern.permute.xlu1 %v77_v2  ;;  %1520 = vset.pattern.permute.xlu0 %v77_v2 }
   0x7   :  { %1522 = vset.pattern.permute.xlu2 %v77_v2  ;;  %v1562_v16 = vpop.eup %1561  ;;  %v29_v17 = vadd.f32 %v28_v15, %v27_v13 }
   0x8   :  { %v35_v18 = vmul.f32 8.0, %v1562_v16  ;;  %vm39_vm1 = vweird.f32 %v1562_v16 }
   0x9   :  { %v30_v19 = vrot.slane %v29_v17, 2 }
   0xa   :  { %v36_v20 = vsub.f32 1.0, %v35_v18 }
   0xb   :  { %v31_v21 = vadd.f32 %v30_v19, %v29_v17 }
   0xc   :  { %v37_v22 = vmul.f32 %v1562_v16, %v36_v20 }
   0xd   :  { %v32_v23 = vrot.slane %v31_v21, 1 }
   0xe   :  { %118 = vperm.xlu0 %1520, %v107_v4   ;;  %92 = vperm.xlu1 %1521, %v81_v5   ;;  %v38_v24 = vadd.f32 %v1562_v16, %v37_v22 }
   0xf   :  { %170 = vperm.xlu2 %1522, %v159_v6   ;;  %v33_v25 = vadd.f32 %v32_v23, %v31_v21 }
  0x10   :  { %v1612_v26 = vsel %vm39_vm1, %v1562_v16, %v38_v24 }
  0x11   :  { %v41_v27 = vmul.f32 %v1612_v26, %v33_v25 }
  0x13   :  { %v42_v28 = vsub.f32 %v20_v12, %v41_v27 }
  0x15   :  { %v43_v29 = vmul.f32 %v42_v28, %v42_v28 }
  0x16   :  { %157 = vperm.xlu0 %1520, %v146_v7   ;;  %105 = vperm.xlu1 %1521, %v94_v8  }
  0x17   :  { %131 = vperm.xlu2 %1522, %v120_v9   ;;  %v44_v30 = vsel %vm26_vm0, %v43_v29, 0.0 }
  0x18   :  { %v45_v31 = vrot.slane %v44_v30, 4 }
  0x1a   :  { %v46_v32 = vadd.f32 %v45_v31, %v44_v30 }
  0x1c   :  { %v47_v33 = vrot.slane %v46_v32, 2 }
  0x1e   :  { %1523 = vset.pattern.permute.xlu1 %v70_v1  ;;  %79 = vperm.xlu0 %1520, %v68_v10   ;;  %v48_v34 = vadd.f32 %v47_v33, %v46_v32 }
  0x1f   :  { %1524 = vset.pattern.permute.xlu2 %v70_v1 }
  0x20   :  { %v49_v35 = vrot.slane %v48_v34, 1 }
  0x22   :  { %v50_v36 = vadd.f32 %v49_v35, %v48_v34 }
  0x24   :  { %v51_v37 = vmul.f32 %v50_v36, %v1612_v26 }
  0x26   :  { %86 = vperm.xlu1 %1523, %v81_v5   ;;  %144 = vperm.xlu0 %1520, %v133_v14   ;;  %v52_v38 = vadd.f32 1e-05, %v51_v37 }
  0x27   :  { %112 = vperm.xlu2 %1524, %v107_v4  }
  0x28   :  { %1563 = vrsqrt.f32 %v52_v38  ;;  %vm59_vm2 = vweird.f32 %v52_v38 }
  0x2e   :  { %125 = vperm.xlu1 %1523, %v120_v9   ;;  %1525 = vset.pattern.permute.xlu0 %v70_v1  ;;  %v1564_v39 = vpop.eup %1563  ;;  %v1570_v9 = vmov 1983009808  }
  0x2f   :  { %151 = vperm.xlu2 %1524, %v146_v7   ;;  %v54_v40 = vmul.f32 %v1564_v39, %v52_v38  ;;  %vm60_vm3 = vweird.f32 %v1564_v39  ;;  %v1571_v38 = vmov 1934713408  }
  0x30   :  { %vm61_vm4 = vmor %vm59_vm2, %vm60_vm3 }
  0x31   :  { %v55_v41 = vmul.f32 %v1564_v39, %v54_v40 }
  0x33   :  { %v56_v42 = vmul.f32 0.5, %v55_v41 }
  0x35   :  { %v57_v43 = vsub.f32 1.5, %v56_v42 }
  0x36   :  { %99 = vperm.xlu1 %1523, %v94_v8   ;;  %73 = vperm.xlu0 %1525, %v68_v10   ;;  %v218_v10 = vunpack.c.l.s4 %v1570_v9 }
  0x37   :  { %138 = vperm.xlu2 %1524, %v133_v14   ;;  %v58_v44 = vmul.f32 %v1564_v39, %v57_v43 }
  0x38   :  { %v1652_v20 = vunpack.c.0.s8 %v218_v10 }
  0x39   :  { %v62_v45 = vsel %vm61_vm4, %v1564_v39, %v58_v44  ;;  %v266_v39 = vunpack.c.l.s4 %v1571_v38 }
  0x3a   :  { %v63_v47 = vmul.f32 %v62_v45, %v42_v28 }
  0x3c   :  { %v65_v49 = vmul.f32 %v1557_v46, %v63_v47 }
  0x3e   :  { %164 = vperm.xlu1 %1523, %v159_v6   ;;  %1556 = vset.pattern.permute.xlu0 %v77_v2  ;;  %v1623_v50 = vadd.f32 %v1558_v48, %v65_v49 }
  0x40   :  { %v175_v54 = vrot.slane %v1623_v50, 3  ;;  %v173_v55 = vrot.slane %v1623_v50, 1  ;;  %v178_v56 = vrot.slane %v1623_v50, 6  ;;  %v174_v57 = vrot.slane %v1623_v50, 2 }
  0x41   :  { %v176_v59 = vrot.slane %v1623_v50, 4  ;;  %v179_v3 = vrot.slane %v1623_v50, 7  ;;  %v180_v8 = vperm.slane %v1623_v50, 0  ;;  %v177_v19 = vrot.slane %v1623_v50, 5 }
  0x42   :  { %v1629_v58 = vperm.slane %v175_v54, 0  ;;  %v1632_v60 = vperm.slane %v173_v55, 0  ;;  %v1634_v62 = vperm.slane %v178_v56, 0  ;;  %v1636_v63 = vperm.slane %v174_v57, 0 }
  0x43   :  { %v1639_v2 = vperm.slane %v176_v59, 0  ;;  %v1647_v13 = vperm.slane %v179_v3, 0  ;;  %v1661_v32 = vperm.slane %v177_v19, 0  ;;  %v1673_v54 = vunpack.c.0.s8 %v266_v39 }
  0x69   :  { %v171_v53 = vpop.permute.xlu2 %170 }
  0x6a   :  { %v211_v28 = vmul.f32 %v1647_v13, %v171_v53 }
  0x6c   :  { %v361_v44 = vrot.slane %v211_v28, 4 }
  0x71   :  { %v132_v5 = vpop.permute.xlu2 %131 }
  0x72   :  { %v205_v12 = vmul.f32 %v1639_v2, %v132_v5 }
  0x74   :  { %v351_v22 = vrot.slane %v205_v12, 4 }
  0x80   :  { %v119_v51 = vpop.permute.xlu0 %118  ;;  %v93_v52 = vpop.permute.xlu1 %92 }
  0x81   :  { %v203_v1 = vmul.f32 %v1629_v58, %v119_v51  ;;  %v199_v4 = vmul.f32 %v1632_v60, %v93_v52  ;;  %v113_v30 = vpop.permute.xlu2 %112 }
  0x83   :  { %v337_v11 = vrot.slane %v203_v1, 4  ;;  %v339_v14 = vrot.slane %v199_v4, 4 }
  0x85   :  { %v338_v21 = vsel %vm213_vm5, %v337_v11, %v199_v4  ;;  %v340_v25 = vsel %vm213_vm5, %v203_v1, %v339_v14 }
  0x86   :  { %v344_v33 = vperm.slane %v338_v21, %v1652_v20  ;;  %v348_v36 = vperm.slane %v340_v25, %v1652_v20 }
  0x88   :  { %v158_v61 = vpop.permute.xlu0 %157  ;;  %v106_v0 = vpop.permute.xlu1 %105  ;;  %v373_v46 = vrot.slane %v344_v33, 4  ;;  %v385_v51 = vrot.slane %v348_v36, 4 }
  0x89   :  { %v209_v6 = vmul.f32 %v1634_v62, %v158_v61  ;;  %v201_v7 = vmul.f32 %v1636_v63, %v106_v0 }
  0x8b   :  { %v349_v16 = vrot.slane %v209_v6, 4  ;;  %v325_v17 = vrot.slane %v201_v7, 4  ;;  %v352_v37 = vsel %vm213_vm5, %v209_v6, %v351_v22  ;;  %v202_v6 = vmul.f32 %v1629_v58, %v113_v30  ;;  %v1481_v58 = vld [vmem:[%s1996_s2 + $0xf8] sm:$0xff] }
  0x8c   :  { %v360_v47 = vperm.slane %v352_v37, %v1652_v20  ;;  %798 = vmatpush.bf16.msra.mxu3 %v1481_v58 }
  0x8d   :  { %v350_v29 = vsel %vm213_vm5, %v349_v16, %v205_v12 }
  0x8e   :  { %v356_v40 = vperm.slane %v350_v29, %v1652_v20  ;;  %v411_v3 = vrot.slane %v360_v47, 4  ;;  %v225_v29 = vrot.slane %v202_v6, 4 }
  0x90   :  { %v80_v15 = vpop.permute.xlu0 %79  ;;  %v399_v55 = vrot.slane %v356_v40, 4 }
  0x91   :  { %v197_v18 = vmul.f32 %v180_v8, %v80_v15 }
  0x93   :  { %v326_v23 = vsel %vm213_vm5, %v325_v17, %v197_v18  ;;  %v327_v24 = vrot.slane %v197_v18, 4  ;;  %v1473_v17 = vld [vmem:[%s1996_s2 + $0xb8] sm:$0xff] }
  0x94   :  { %v332_v27 = vperm.slane %v326_v23, %v1652_v20  ;;  %785 = vmatpush.bf16.msra.mxu2 %v1473_v17 }
  0x95   :  { %v328_v31 = vsel %vm213_vm5, %v201_v7, %v327_v24  ;;  %v152_v7 = vpop.permute.xlu2 %151 }
  0x96   :  { %v336_v34 = vperm.slane %v328_v31, %v1652_v20  ;;  %v375_v35 = vrot.slane %v332_v27, 4  ;;  %v374_v56 = vsel %vm213_vm5, %v373_v46, %v332_v27  ;;  %v1471_v46 = vld [vmem:[%s1996_s2 + $0xa8] sm:$0xff] }
  0x97   :  { %v380_v10 = vperm.slane %v374_v56, %v1673_v54 }
  0x98   :  { %v387_v41 = vrot.slane %v336_v34, 4  ;;  %v87_v42 = vpop.permute.xlu1 %86  ;;  %v145_v43 = vpop.permute.xlu0 %144  ;;  %v376_v48 = vsel %vm213_vm5, %v344_v33, %v375_v35  ;;  %v386_v1 = vsel %vm213_vm5, %v385_v51, %v336_v34 }
  0x99   :  { %v207_v45 = vmul.f32 %v1661_v32, %v145_v43  ;;  %v384_v61 = vperm.slane %v376_v48, %v1673_v54  ;;  %v392_v16 = vperm.slane %v386_v1, %v1673_v54  ;;  %v198_v23 = vmul.f32 %v1632_v60, %v87_v42  ;;  %v1480_v60 = vld [vmem:[%s1996_s2 + $0xf0] sm:$0xff] }
  0x9a   :  { %v388_v49 = vsel %vm213_vm5, %v348_v36, %v387_v41  ;;  %v423_v36 = vrot.slane %v380_v10, 4  ;;  %v208_v42 = vmul.f32 %v1634_v62, %v152_v7  ;;  %799 = vmatpush.bf16.msra.mxu3 %v1480_v60  ;;  %v1479_v62 = vld [vmem:[%s1996_s2 + $0xe8] sm:$0xff] }
  0x9b   :  { %v362_v52 = vsel %vm213_vm5, %v361_v44, %v207_v45  ;;  %v363_v53 = vrot.slane %v207_v45, 4  ;;  %v396_v0 = vperm.slane %v388_v49, %v1673_v54  ;;  %v427_v19 = vrot.slane %v384_v61, 4 }
  0x9c   :  { %v368_v57 = vperm.slane %v362_v52, %v1652_v20  ;;  %v431_v37 = vrot.slane %v392_v16, 4  ;;  %v227_v43 = vrot.slane %v198_v23, 4 }
  0x9d   :  { %v364_v59 = vsel %vm213_vm5, %v211_v28, %v363_v53  ;;  %v435_v21 = vrot.slane %v396_v0, 4  ;;  %v1472_v28 = vld [vmem:[%s1996_s2 + $0xb0] sm:$0xff]  ;;  %v139_v56 = vpop.permute.xlu2 %138 }
  0x9e   :  { %v372_v4 = vperm.slane %v364_v59, %v1652_v20  ;;  %v397_v5 = vrot.slane %v368_v57, 4  ;;  %v400_v9 = vsel %vm213_vm5, %v368_v57, %v399_v55  ;;  %786 = vmatpush.bf16.msra.mxu2 %v1472_v28  ;;  %v226_v55 = vsel %vm213_vm5, %v225_v29, %v198_v23  ;;  %800 = vmatpush.bf16.msra.mxu3 %v1479_v62 }
  0x9f   :  { %v408_v14 = vperm.slane %v400_v9, %v1673_v54  ;;  %v228_v1 = vsel %vm213_vm5, %v202_v6, %v227_v43  ;;  %v232_v50 = vperm.slane %v226_v55, %v1652_v20 }
  0xa0   :  { %v409_v11 = vrot.slane %v372_v4, 4  ;;  %v126_v12 = vpop.permute.xlu1 %125  ;;  %v412_v15 = vsel %vm213_vm5, %v372_v4, %v411_v3  ;;  %v398_v22 = vsel %vm213_vm5, %v397_v5, %v356_v40  ;;  %v1470_v3 = vld [vmem:[%s1996_s2 + $0xa0] sm:$0xff]  ;;  %v236_v6 = vperm.slane %v228_v1, %v1652_v20 }
  0xa1   :  { %v420_v18 = vperm.slane %v412_v15, %v1673_v54  ;;  %v425_v24 = vrot.slane %v408_v14, 4  ;;  %v404_v25 = vperm.slane %v398_v22, %v1673_v54  ;;  %v428_v30 = vsel %vm213_vm5, %v408_v14, %v427_v19 }
  0xa2   :  { %v410_v27 = vsel %vm213_vm5, %v409_v11, %v360_v47  ;;  %v204_v38 = vmul.f32 %v1639_v2, %v126_v12  ;;  %787 = vmatpush.bf16.msra.mxu2 %v1471_v46  ;;  %v261_v15 = vrot.slane %v232_v50, 4 }
  0xa3   :  { %v436_v31 = vsel %vm213_vm5, %v420_v18, %v435_v21  ;;  %v433_v33 = vrot.slane %v420_v18, 4  ;;  %v416_v35 = vperm.slane %v410_v27, %v1673_v54  ;;  %v426_v39 = vsel %vm213_vm5, %v425_v24, %v384_v61 }
  0xa4   :  { %v1536_v34 = vpack.i.bf16 %v436_v31, %v428_v30  ;;  %v421_v41 = vrot.slane %v404_v25, 4  ;;  %v424_v2 = vsel %vm213_vm5, %v404_v25, %v423_v36  ;;  %v239_v57 = vrot.slane %v204_v38, 4 }
  0xa5   :  { %v434_v40 = vsel %vm213_vm5, %v433_v33, %v396_v0  ;;  %v429_v45 = vrot.slane %v416_v35, 4  ;;  %v432_v47 = vsel %vm213_vm5, %v416_v35, %v431_v37  ;;  %v237_v0 = vrot.slane %v208_v42, 4 }
  0xa6   :  { %1537 = vrot.lane.b32.xlu1 %v1536_v34, %s1572_s7  ;;  %v1531_v44 = vpack.i.bf16 %v434_v40, %v426_v39  ;;  %v1722_v48 = vsel %vm213_vm5, %v421_v41, %v380_v10  ;;  %v1526_v52 = vpack.i.bf16 %v432_v47, %v424_v2  ;;  %v240_v7 = vsel %vm213_vm5, %v208_v42, %v239_v57 }
  0xa7   :  { %v1726_v53 = vsel %vm213_vm5, %v429_v45, %v392_v16  ;;  %v238_v11 = vsel %vm213_vm5, %v237_v0, %v204_v38  ;;  %788 = vmatpush.bf16.msra.mxu2 %v1470_v3  ;;  %v248_v16 = vperm.slane %v240_v7, %v1652_v20  ;;  %v273_v18 = vrot.slane %v236_v6, 4  ;;  %v1457_v7 = vld [vmem:[%s1996_s2 + $0x38] sm:$0xff] }
  0xa8   :  { %v100_v49 = vpop.permute.xlu1 %99  ;;  %v74_v51 = vpop.permute.xlu0 %73  ;;  %1532 = vrot.lane.b32.xlu0 %v1531_v44, %s1573_s12  ;;  %1527 = vrot.lane.b32.xlu2 %v1526_v52, %s1574_s13  ;;  %v244_v21 = vperm.slane %v238_v11, %v1652_v20  ;;  %v1476_v11 = vld [vmem:[%s1996_s2 + $0xd0] sm:$0xff] }
  0xa9   :  { %v200_v59 = vmul.f32 %v1636_v63, %v100_v49  ;;  %v196_v61 = vmul.f32 %v180_v8, %v74_v51  ;;  %v1478_v63 = vld [vmem:[%s1996_s2 + $0xe0] sm:$0xff]  ;;  %v206_v8 = vmul.f32 %v1661_v32, %v139_v56  ;;  %v299_v30 = vrot.slane %v248_v16, 4  ;;  %759 = vmatpush.bf16.msra.mxu0 %v1457_v7  ;;  %v1484_v7 = vld [vmem:[%s1997_s3 + $0x10] sm:$0xff] }
  0xaa   :  { %801 = vmatpush.bf16.msra.mxu3 %v1478_v63  ;;  %v287_v60 = vrot.slane %v244_v21, 4 }
  0xab   :  { %v212_v4 = vrot.slane %v200_v59, 4  ;;  %v215_v5 = vrot.slane %v196_v61, 4  ;;  %v251_v19 = vrot.slane %v206_v8, 4 }
  0xad   :  { %v214_v9 = vsel %vm213_vm5, %v212_v4, %v196_v61  ;;  %v216_v10 = vsel %vm213_vm5, %v200_v59, %v215_v5 }
  0xae   :  { %v220_v12 = vperm.slane %v214_v9, %v1652_v20  ;;  %v224_v14 = vperm.slane %v216_v10, %v1652_v20  ;;  %v1465_v9 = vld [vmem:[%s1996_s2 + $0x78] sm:$0xff]  ;;  %v1468_v10 = vld [vmem:[%s1996_s2 + $0x90] sm:$0xff] }
  0xaf   :  { %772 = vmatpush.bf16.msra.mxu1 %v1465_v9  ;;  %v1492_v9 = vld [vmem:[%s1997_s3 + $0x50] sm:$0xff] }
  0xb0   :  { %v263_v32 = vrot.slane %v220_v12, 4  ;;  %v275_v17 = vrot.slane %v224_v14, 4  ;;  %v165_v58 = vpop.permute.xlu1 %164  ;;  %v262_v23 = vsel %vm213_vm5, %v261_v15, %v220_v12  ;;  %v274_v29 = vsel %vm213_vm5, %v273_v18, %v224_v14  ;;  %v1456_v12 = vld [vmem:[%s1996_s2 + $0x30] sm:$0xff]  ;;  %v1467_v15 = vld [vmem:[%s1996_s2 + $0x88] sm:$0xff]  ;;  %v1474_v18 = vld [vmem:[%s1996_s2 + $0xc0] sm:$0xff] }
  0xb1   :  { %v210_v22 = vmul.f32 %v1647_v13, %v165_v58  ;;  %v268_v35 = vperm.slane %v262_v23, %v1673_v54  ;;  %v280_v39 = vperm.slane %v274_v29, %v1673_v54  ;;  %v1464_v14 = vld [vmem:[%s1996_s2 + $0x70] sm:$0xff]  ;;  %760 = vmatpush.bf16.msra.mxu0 %v1456_v12  ;;  %v1466_v58 = vld [vmem:[%s1996_s2 + $0x80] sm:$0xff]  ;;  %v1453_v29 = vld [vmem:[%s1996_s2 + $0x18] sm:$0xff] }
  0xb2   :  { %v264_v24 = vsel %vm213_vm5, %v232_v50, %v263_v32  ;;  %v276_v25 = vsel %vm213_vm5, %v236_v6, %v275_v17  ;;  %v1477_v6 = vld [vmem:[%s1996_s2 + $0xd8] sm:$0xff]  ;;  %v1455_v32 = vld [vmem:[%s1996_s2 + $0x28] sm:$0xff]  ;;  %v1512_v23 = vld [vmem:[%s1997_s3 + $0xf0] sm:$0xff] }
  0xb3   :  { %v249_v27 = vrot.slane %v210_v22, 4  ;;  %v252_v28 = vsel %vm213_vm5, %v210_v22, %v251_v19  ;;  %v272_v33 = vperm.slane %v264_v24, %v1673_v54  ;;  %v284_v13 = vperm.slane %v276_v25, %v1673_v54  ;;  %802 = vmatpush.bf16.msra.mxu3 %v1477_v6  ;;  %773 = vmatpush.bf16.msra.mxu1 %v1464_v14  ;;  %v1463_v17 = vld [vmem:[%s1996_s2 + $0x68] sm:$0xff]  ;;  %v1505_v19 = vld [vmem:[%s1997_s3 + $0xb8] sm:$0xff]  ;;  %v1504_v22 = vld [vmem:[%s1997_s3 + $0xb0] sm:$0xff] }
  0xb4   :  { %v260_v31 = vperm.slane %v252_v28, %v1652_v20  ;;  %v311_v62 = vrot.slane %v268_v35, 4  ;;  %v319_v49 = vrot.slane %v280_v39, 4  ;;  %v1454_v24 = vld [vmem:[%s1996_s2 + $0x20] sm:$0xff]  ;;  %v1511_v28 = vld [vmem:[%s1997_s3 + $0xe8] sm:$0xff] }
  0xb5   :  { %v250_v34 = vsel %vm213_vm5, %v249_v27, %v206_v8  ;;  %v315_v43 = vrot.slane %v272_v33, 4  ;;  %v323_v46 = vrot.slane %v284_v13, 4  ;;  %v1469_v8 = vld [vmem:[%s1996_s2 + $0x98] sm:$0xff]  ;;  %761 = vmatpush.bf16.msra.mxu0 %v1455_v32  ;;  %v1462_v25 = vld [vmem:[%s1996_s2 + $0x60] sm:$0xff]  ;;  %v1503_v27 = vld [vmem:[%s1997_s3 + $0xa8] sm:$0xff] }
  0xb6   :  { %v256_v36 = vperm.slane %v250_v34, %v1652_v20  ;;  %v297_v37 = vrot.slane %v260_v31, 4  ;;  %v300_v38 = vsel %vm213_vm5, %v260_v31, %v299_v30  ;;  %789 = vmatpush.bf16.msra.mxu2 %v1469_v8  ;;  %v1461_v30 = vld [vmem:[%s1996_s2 + $0x58] sm:$0xff]  ;;  %v1502_v31 = vld [vmem:[%s1997_s3 + $0xa0] sm:$0xff]  ;;  %v1460_v34 = vld [vmem:[%s1996_s2 + $0x50] sm:$0xff] }
  0xb7   :  { %v308_v40 = vperm.slane %v300_v38, %v1673_v54  ;;  %803 = vmatpush.bf16.msra.mxu3 %v1476_v11  ;;  %774 = vmatpush.bf16.msra.mxu1 %v1463_v17  ;;  %v1500_v38 = vld [vmem:[%s1997_s3 + $0x90] sm:$0xff]  ;;  %v1482_v32 = vld [vmem:[%s1997_s3] sm:$0xff] }
  0xb8   :  { %v285_v41 = vrot.slane %v256_v36, 4  ;;  %v288_v42 = vsel %vm213_vm5, %v256_v36, %v287_v60  ;;  %v298_v44 = vsel %vm213_vm5, %v297_v37, %v248_v16  ;;  %v1475_v16 = vld [vmem:[%s1996_s2 + $0xc8] sm:$0xff]  ;;  %v1452_v60 = vld [vmem:[%s1996_s2 + $0x10] sm:$0xff]  ;;  %v1490_v17 = vld [vmem:[%s1997_s3 + $0x40] sm:$0xff] }
  0xb9   :  { %v296_v45 = vperm.slane %v288_v42, %v1673_v54  ;;  %v321_v2 = vrot.slane %v308_v40, 4  ;;  %v304_v47 = vperm.slane %v298_v44, %v1673_v54  ;;  %v324_v52 = vsel %vm213_vm5, %v308_v40, %v323_v46  ;;  %762 = vmatpush.bf16.msra.mxu0 %v1454_v24  ;;  %v1451_v36 = vld [vmem:[%s1996_s2 + $0x8] sm:$0xff]  ;;  %v1450_v40 = vld [vmem:[%s1996_s2] sm:$0xff]  ;;  %v1489_v42 = vld [vmem:[%s1997_s3 + $0x38] sm:$0xff] }
  0xba   :  { %v286_v20 = vsel %vm213_vm5, %v285_v41, %v244_v21  ;;  %790 = vmatpush.bf16.msra.mxu2 %v1468_v10  ;;  %v1513_v21 = vld [vmem:[%s1997_s3 + $0xf8] sm:$0xff]  ;;  %v1459_v37 = vld [vmem:[%s1996_s2 + $0x48] sm:$0xff]  ;;  %v1458_v41 = vld [vmem:[%s1996_s2 + $0x40] sm:$0xff] }
  0xbb   :  { %v316_v51 = vsel %vm213_vm5, %v296_v45, %v315_v43  ;;  %v313_v55 = vrot.slane %v296_v45, 4  ;;  %v292_v56 = vperm.slane %v286_v20, %v1673_v54  ;;  %v322_v59 = vsel %vm213_vm5, %v321_v2, %v284_v13  ;;  %804 = vmatpush.bf16.msra.mxu3 %v1475_v16  ;;  %775 = vmatpush.bf16.msra.mxu1 %v1462_v25  ;;  %v1501_v13 = vld [vmem:[%s1997_s3 + $0x98] sm:$0xff]  ;;  %v1499_v44 = vld [vmem:[%s1997_s3 + $0x88] sm:$0xff]  ;;  %v1488_v46 = vld [vmem:[%s1997_s3 + $0x30] sm:$0xff] }
  0xbc   :  { %v1551_v57 = vpack.i.bf16 %v324_v52, %v316_v51  ;;  %v317_v61 = vrot.slane %v304_v47, 4  ;;  %v320_v4 = vsel %vm213_vm5, %v304_v47, %v319_v49  ;;  %v1497_v43 = vld [vmem:[%s1997_s3 + $0x78] sm:$0xff]  ;;  %v1507_v45 = vld [vmem:[%s1997_s3 + $0xc8] sm:$0xff]  ;;  %v1496_v2 = vld [vmem:[%s1997_s3 + $0x70] sm:$0xff] }
  0xbd   :  { %v314_v0 = vsel %vm213_vm5, %v313_v55, %v272_v33  ;;  %v309_v1 = vrot.slane %v292_v56, 4  ;;  %v312_v3 = vsel %vm213_vm5, %v292_v56, %v311_v62  ;;  %v1510_v33 = vld [vmem:[%s1997_s3 + $0xe0] sm:$0xff]  ;;  %763 = vmatpush.bf16.msra.mxu0 %v1453_v29  ;;  %v1487_v62 = vld [vmem:[%s1997_s3 + $0x28] sm:$0xff] }
  0xbe   :  { %1552 = vrot.lane.b32.xlu1 %v1551_v57, %s1572_s7  ;;  %v1546_v5 = vpack.i.bf16 %v322_v59, %v314_v0  ;;  %v1541_v63 = vpack.i.bf16 %v320_v4, %v312_v3  ;;  %v1780_v50 = vsel %vm213_vm5, %v317_v61, %v280_v39  ;;  %791 = vmatpush.bf16.msra.mxu2 %v1467_v15  ;;  %v1508_v39 = vld [vmem:[%s1997_s3 + $0xd0] sm:$0xff]  ;;  %v1498_v47 = vld [vmem:[%s1997_s3 + $0x80] sm:$0xff]  ;;  %v1495_v49 = vld [vmem:[%s1997_s3 + $0x68] sm:$0xff] }
  0xbf   :  { %v1783_v54 = vsel %vm213_vm5, %v309_v1, %v268_v35  ;;  %805 = vmatpush.bf16.msra.mxu3 %v1474_v18  ;;  %776 = vmatpush.bf16.msra.mxu1 %v1461_v30  ;;  %v1509_v35 = vld [vmem:[%s1997_s3 + $0xd8] sm:$0xff]  ;;  %v1506_v20 = vld [vmem:[%s1997_s3 + $0xc0] sm:$0xff]  ;;  %v1483_v15 = vld [vmem:[%s1997_s3 + $0x8] sm:$0xff] }
  0xc0   :  { %1547 = vrot.lane.b32.xlu0 %v1546_v5, %s1573_s12  ;;  %1542 = vrot.lane.b32.xlu2 %v1541_v63, %s1574_s13  ;;  %v1486_v51 = vld [vmem:[%s1997_s3 + $0x20] sm:$0xff]  ;;  %v1485_v61 = vld [vmem:[%s1997_s3 + $0x18] sm:$0xff] }
  0xc1   :  { %764 = vmatpush.bf16.msra.mxu0 %v1452_v60  ;;  %v1494_v52 = vld [vmem:[%s1997_s3 + $0x60] sm:$0xff]  ;;  %v1493_v0 = vld [vmem:[%s1997_s3 + $0x58] sm:$0xff]  ;;  %v1491_v16 = vld [vmem:[%s1997_s3 + $0x48] sm:$0xff] }
  0xc2   :  { %792 = vmatpush.bf16.msra.mxu2 %v1466_v58 }
  0xc3   :  { %1106 = vmatpush.bf16.msrb.mxu3 %v1513_v21  ;;  %777 = vmatpush.bf16.msra.mxu1 %v1460_v34 }
  0xc5   :  { %765 = vmatpush.bf16.msra.mxu0 %v1451_v36 }
  0xc6   :  { %1093 = vmatpush.bf16.msrb.mxu2 %v1505_v19 }
  0xc7   :  { %1107 = vmatpush.bf16.msrb.mxu3 %v1512_v23  ;;  %778 = vmatpush.bf16.msra.mxu1 %v1459_v37 }
  0xc9   :  { %766 = vmatpush.bf16.msra.mxu0 %v1450_v40 }
  0xca   :  { %1094 = vmatpush.bf16.msrb.mxu2 %v1504_v22 }
  0xcb   :  { %1108 = vmatpush.bf16.msrb.mxu3 %v1511_v28  ;;  %779 = vmatpush.bf16.msra.mxu1 %v1458_v41 }
  0xcd   :  { %1067 = vmatpush.bf16.msrb.mxu0 %v1489_v42 }
  0xce   :  { %1095 = vmatpush.bf16.msrb.mxu2 %v1503_v27 }
  0xcf   :  { %1109 = vmatpush.bf16.msrb.mxu3 %v1510_v33  ;;  %1080 = vmatpush.bf16.msrb.mxu1 %v1497_v43 }
  0xd1   :  { %1068 = vmatpush.bf16.msrb.mxu0 %v1488_v46 }
  0xd2   :  { %1096 = vmatpush.bf16.msrb.mxu2 %v1502_v31 }
  0xd3   :  { %1110 = vmatpush.bf16.msrb.mxu3 %v1509_v35  ;;  %1081 = vmatpush.bf16.msrb.mxu1 %v1496_v2 }
  0xd5   :  { %1069 = vmatpush.bf16.msrb.mxu0 %v1487_v62 }
  0xd6   :  { %1097 = vmatpush.bf16.msrb.mxu2 %v1501_v13 }
  0xd7   :  { %1111 = vmatpush.bf16.msrb.mxu3 %v1508_v39  ;;  %1082 = vmatpush.bf16.msrb.mxu1 %v1495_v49 }
  0xd9   :  { %1070 = vmatpush.bf16.msrb.mxu0 %v1486_v51 }
  0xda   :  { %1098 = vmatpush.bf16.msrb.mxu2 %v1500_v38 }
  0xdb   :  { %1112 = vmatpush.bf16.msrb.mxu3 %v1507_v45  ;;  %1083 = vmatpush.bf16.msrb.mxu1 %v1494_v52 }
  0xdd   :  { %1071 = vmatpush.bf16.msrb.mxu0 %v1485_v61 }
  0xde   :  { %1099 = vmatpush.bf16.msrb.mxu2 %v1499_v44 }
  0xdf   :  { %1113 = vmatpush.bf16.msrb.mxu3 %v1506_v20  ;;  %1084 = vmatpush.bf16.msrb.mxu1 %v1493_v0 }
  0xe1   :  { %1072 = vmatpush.bf16.msrb.mxu0 %v1484_v7 }
  0xe2   :  { %1100 = vmatpush.bf16.msrb.mxu2 %v1498_v47 }
  0xe3   :  { %1085 = vmatpush.bf16.msrb.mxu1 %v1492_v9 }
  0xe5   :  { %1073 = vmatpush.bf16.msrb.mxu0 %v1483_v15 }
  0xe7   :  { %1086 = vmatpush.bf16.msrb.mxu1 %v1491_v16 }
  0xe9   :  { %1074 = vmatpush.bf16.msrb.mxu0 %v1482_v32 }
  0xeb   :  { %1087 = vmatpush.bf16.msrb.mxu1 %v1490_v17 }
 0x102   :  { %v1528_v55 = vpop.permute.xlu2 %1527 }
 0x103   :  { %v1530_v56 = vunpack.i.h.bf16 %v1528_v55  ;;  %v1529_v57 = vunpack.i.l.bf16 %v1528_v55 }
 0x105   :  { %v493_v8 = vsel %vm26_vm0, %v1722_v48, %v1529_v57  ;;  %v496_v6 = vsel %vm26_vm0, %v1726_v53, %v1530_v56 }
 0x118   :  { %v1538_v59 = vpop.permute.xlu1 %1537 }
 0x119   :  { %v1540_v5 = vunpack.i.h.bf16 %v1538_v59  ;;  %v1539_v63 = vunpack.i.l.bf16 %v1538_v59 }
 0x11a   :  { %v1533_v1 = vpop.permute.xlu0 %1532  ;;  %v1543_v58 = vpop.permute.xlu2 %1542 }
 0x11b   :  { %v1535_v3 = vunpack.i.h.bf16 %v1533_v1  ;;  %v1534_v4 = vunpack.i.l.bf16 %v1533_v1  ;;  %v1545_v18 = vunpack.i.h.bf16 %v1543_v58  ;;  %v1544_v19 = vunpack.i.l.bf16 %v1543_v58 }
 0x11d   :  { %v494_v10 = vsel %vm486_vm6, %v493_v8, %v1534_v4  ;;  %v497_v11 = vsel %vm486_vm6, %v496_v6, %v1535_v3  ;;  %v490_v25 = vsel %vm26_vm0, %v1780_v50, %v1545_v18  ;;  %v485_v27 = vsel %vm26_vm0, %v1783_v54, %v1544_v19 }
 0x11e   :  { %v495_v12 = vsel %vm488_vm7, %v494_v10, %v1539_v63  ;;  %v498_v48 = vsel %vm488_vm7, %v497_v11, %v1540_v5 }
 0x11f   :  { %v501_v14 = vpack.c.bf16 %v495_v12, %v495_v12  ;;  %v502_v53 = vpack.c.bf16 %v498_v48, %v498_v48 }
 0x121   :  { %793 = vmatmul.bf16.vlgmr.msra.gmra.mxu2 %v501_v14  ;;  %806 = vmatmul.bf16.vlgmr.msra.gmra.mxu3 %v502_v53 }
 0x130   :  { %v1553_v21 = vpop.permute.xlu1 %1552 }
 0x131   :  { %1101 = vmatmul.bf16.vlgmr.msrb.gmra.mxu2 %v501_v14  ;;  %1114 = vmatmul.bf16.vlgmr.msrb.gmra.mxu3 %v502_v53  ;;  %v1555_v28 = vunpack.i.h.bf16 %v1553_v21  ;;  %v1554_v29 = vunpack.i.l.bf16 %v1553_v21 }
 0x132   :  { %v1548_v22 = vpop.permute.xlu0 %1547 }
 0x133   :  { %v1550_v23 = vunpack.i.h.bf16 %v1548_v22  ;;  %v1549_v24 = vunpack.i.l.bf16 %v1548_v22 }
 0x135   :  { %v487_v30 = vsel %vm486_vm6, %v485_v27, %v1549_v24  ;;  %v491_v31 = vsel %vm486_vm6, %v490_v25, %v1550_v23 }
 0x136   :  { %v489_v33 = vsel %vm488_vm7, %v487_v30, %v1554_v29  ;;  %v492_v60 = vsel %vm488_vm7, %v491_v31, %v1555_v28 }
 0x137   :  { %v499_v34 = vpack.c.bf16 %v489_v33, %v489_v33  ;;  %v500_v13 = vpack.c.bf16 %v492_v60, %v492_v60 }
 0x139   :  { %767 = vmatmul.bf16.vlgmr.msra.gmra.mxu0 %v499_v34  ;;  %780 = vmatmul.bf16.vlgmr.msra.gmra.mxu1 %v500_v13 }
 0x149   :  { %1075 = vmatmul.bf16.vlgmr.msrb.gmra.mxu0 %v499_v34  ;;  %1088 = vmatmul.bf16.vlgmr.msrb.gmra.mxu1 %v500_v13 }
 0x1a4   :  { %v794_v50 = vpop.f32.mrf.mxu2  ;;  %v807_v35 = vpop.f32.mrf.mxu3 }
 0x1ac   :  { %v796_v36 = vpop.f32.mrf.mxu2  ;;  %v809_v54 = vpop.f32.mrf.mxu3 }
 0x1ad   :  { %v1559_v54 = vld [vmem:[%s1993_s4 + $0x2] ss:$0 sm:$0xff] }
 0x1b4   :  { %v1102_v37 = vpop.f32.mrf.mxu2  ;;  %v1115_v38 = vpop.f32.mrf.mxu3 }
 0x1b6   :  { %v768_v39 = vpop.f32.mrf.mxu0  ;;  %v781_v40 = vpop.f32.mrf.mxu1 }
 0x1b7   :  { %v782_v41 = vadd.f32 %v781_v40, %v768_v39  ;;  %v1560_v39 = vld [vmem:[%s1993_s4 + $0x3] ss:$0 sm:$0xff] }
 0x1b9   :  { %v795_v42 = vadd.f32 %v794_v50, %v782_v41 }
 0x1bb   :  { %v808_v43 = vadd.f32 %v807_v35, %v795_v42 }
 0x1bc   :  { %v1104_v44 = vpop.f32.mrf.mxu2  ;;  %v1117_v45 = vpop.f32.mrf.mxu3 }
 0x1bd   :  { %v1119_v46 = vsel %vm26_vm0, %v808_v43, 0.0 }
 0x1be   :  { %v1120_v2 = vrot.slane %v1119_v46, 4  ;;  %v770_v47 = vpop.f32.mrf.mxu0  ;;  %v783_v20 = vpop.f32.mrf.mxu1 }
 0x1c0   :  { %v1121_v62 = vadd.f32 %v1120_v2, %v1119_v46 }
 0x1c2   :  { %v1122_v49 = vrot.slane %v1121_v62, 2 }
 0x1c4   :  { %v1123_v51 = vadd.f32 %v1122_v49, %v1121_v62 }
 0x1c6   :  { %v1124_v52 = vrot.slane %v1123_v51, 1  ;;  %v1076_v55 = vpop.f32.mrf.mxu0  ;;  %v1089_v56 = vpop.f32.mrf.mxu1 }
 0x1c7   :  { %v1090_v57 = vadd.f32 %v1089_v56, %v1076_v55 }
 0x1c8   :  { %v1125_v59 = vadd.f32 %v1124_v52, %v1123_v51 }
 0x1c9   :  { %v1103_v61 = vadd.f32 %v1102_v37, %v1090_v57 }
 0x1ca   :  { %v1126_v0 = vmul.f32 %v1125_v59, %v1612_v26 }
 0x1cb   :  { %v1116_v1 = vadd.f32 %v1115_v38, %v1103_v61 }
 0x1cc   :  { %v1127_v3 = vsub.f32 %v808_v43, %v1126_v0 }
 0x1cd   :  { %v1156_v4 = vsel %vm26_vm0, %v1116_v1, 0.0 }
 0x1ce   :  { %v1128_v5 = vmul.f32 %v1127_v3, %v1127_v3  ;;  %v1157_v63 = vrot.slane %v1156_v4, 4  ;;  %v1078_v8 = vpop.f32.mrf.mxu0  ;;  %v1091_v6 = vpop.f32.mrf.mxu1 }
 0x1d0   :  { %v1129_v7 = vsel %vm26_vm0, %v1128_v5, 0.0  ;;  %v1158_v9 = vadd.f32 %v1157_v63, %v1156_v4 }
 0x1d1   :  { %v1130_v10 = vrot.slane %v1129_v7, 4 }
 0x1d2   :  { %v1159_v11 = vrot.slane %v1158_v9, 2 }
 0x1d3   :  { %v1131_v12 = vadd.f32 %v1130_v10, %v1129_v7 }
 0x1d4   :  { %v1160_v48 = vadd.f32 %v1159_v11, %v1158_v9 }
 0x1d5   :  { %v1132_v14 = vrot.slane %v1131_v12, 2 }
 0x1d6   :  { %v1161_v53 = vrot.slane %v1160_v48, 1 }
 0x1d7   :  { %v1133_v15 = vadd.f32 %v1132_v14, %v1131_v12 }
 0x1d8   :  { %v1162_v16 = vadd.f32 %v1161_v53, %v1160_v48 }
 0x1d9   :  { %v1134_v32 = vrot.slane %v1133_v15, 1 }
 0x1da   :  { %v1163_v17 = vmul.f32 %v1162_v16, %v1612_v26 }
 0x1db   :  { %v1135_v58 = vadd.f32 %v1134_v32, %v1133_v15 }
 0x1dc   :  { %v1164_v18 = vsub.f32 %v1116_v1, %v1163_v17 }
 0x1dd   :  { %v1136_v19 = vmul.f32 %v1135_v58, %v1612_v26 }
 0x1de   :  { %v1165_v21 = vmul.f32 %v1164_v18, %v1164_v18 }
 0x1df   :  { %v1137_v22 = vadd.f32 1e-05, %v1136_v19 }
 0x1e0   :  { %v1166_v23 = vsel %vm26_vm0, %v1165_v21, 0.0 }
 0x1e1   :  { %1565 = vrsqrt.f32 %v1137_v22  ;;  %v1167_v24 = vrot.slane %v1166_v23, 4  ;;  %vm1144_vm9 = vweird.f32 %v1137_v22 }
 0x1e3   :  { %v1168_v25 = vadd.f32 %v1167_v24, %v1166_v23 }
 0x1e5   :  { %v1169_v27 = vrot.slane %v1168_v25, 2 }
 0x1e7   :  { %v1566_v28 = vpop.eup %1565  ;;  %v1170_v29 = vadd.f32 %v1169_v27, %v1168_v25 }
 0x1e8   :  { %v1139_v30 = vmul.f32 %v1566_v28, %v1137_v22  ;;  %vm1145_vm8 = vweird.f32 %v1566_v28 }
 0x1e9   :  { %v1171_v31 = vrot.slane %v1170_v29, 1  ;;  %vm1146_vm10 = vmor %vm1144_vm9, %vm1145_vm8 }
 0x1ea   :  { %v1140_v33 = vmul.f32 %v1566_v28, %v1139_v30 }
 0x1eb   :  { %v1172_v60 = vadd.f32 %v1171_v31, %v1170_v29 }
 0x1ec   :  { %v1141_v34 = vmul.f32 0.5, %v1140_v33 }
 0x1ed   :  { %v1173_v13 = vmul.f32 %v1172_v60, %v1612_v26 }
 0x1ee   :  { %v1142_v50 = vsub.f32 1.5, %v1141_v34 }
 0x1ef   :  { %v1174_v35 = vadd.f32 1e-05, %v1173_v13 }
 0x1f0   :  { %v1143_v36 = vmul.f32 %v1566_v28, %v1142_v50 }
 0x1f1   :  { %1567 = vrsqrt.f32 %v1174_v35  ;;  %vm1181_vm13 = vweird.f32 %v1174_v35 }
 0x1f2   :  { %v1147_v37 = vsel %vm1146_vm10, %v1566_v28, %v1143_v36 }
 0x1f3   :  { %v1148_v38 = vmul.f32 %v1147_v37, %v1127_v3 }
 0x1f5   :  { %v1150_v40 = vmul.f32 %v1559_v54, %v1148_v38 }
 0x1f7   :  { %v1568_v41 = vpop.eup %1567  ;;  %v1152_v26 = vadd.f32 %v1560_v39, %v1150_v40 }
 0x1f8   :  { %v1176_v42 = vmul.f32 %v1568_v41, %v1174_v35  ;;  %vm1182_vm12 = vweird.f32 %v1568_v41 }
 0x1f9   :  { %v1153_v43 = vpack.c.bf16 %v1152_v26, %v1152_v26  ;;  %vm1183_vm14 = vmor %vm1181_vm13, %vm1182_vm12 }
 0x1fa   :  { %v1177_v44 = vmul.f32 %v1568_v41, %v1176_v42 }
 0x1fb   :  { %1155 = vst.msk [vmem:[%s1998_s5] sm:$0xf] %vm1154_vm11, %v1153_v43 }
 0x1fc   :  { %v1178_v45 = vmul.f32 0.5, %v1177_v44 }
 0x1fe   :  { %v1179_v46 = vsub.f32 1.5, %v1178_v45 }
 0x200   :  { %v1180_v2 = vmul.f32 %v1568_v41, %v1179_v46 }
 0x202   :  { %v1184_v47 = vsel %vm1183_vm14, %v1568_v41, %v1180_v2 }
 0x203   :  { %v1185_v20 = vmul.f32 %v1184_v47, %v1164_v18 }
 0x205   :  { %v1186_v62 = vmul.f32 %v1559_v54, %v1185_v20 }
 0x207   :  { %v1187_v49 = vadd.f32 %v1560_v39, %v1186_v62 }
 0x209   :  { %v1188_v51 = vpack.c.bf16 %v1187_v49, %v1187_v49 }
 0x20b   :  { %1189 = vst.msk [vmem:[%s1998_s5 + $0x4] sm:$0xf] %vm1154_vm11, %v1188_v51 }

</bundles_post_ra>
